<compile_context>
chip_gen: v5e
topology: v5e:2x2
jax: 0.10.0
libtpu: 0.0.40
codegen_flags: <defaults>
</compile_context>

<pallas_src>
import jax
import jax.numpy as jnp
from jax.experimental import pallas as pl
from jax.experimental.pallas import tpu as pltpu


def _round_up(n, m):
    return ((n + m - 1) // m) * m


def _decoder_kernel(x_ref, w1_ref, b1_ref, w2_ref, b2_ref, o_ref):
    """One batch tile: o = relu(x @ w1 + b1) @ w2 + b2, written lane-dense.

    x_ref : (TB, D_in) compute dtype (bf16)  -- streamed per grid step
    w1_ref: (D_in, H)  compute dtype (bf16)  -- VMEM-resident across steps
    b1_ref: (1, H)     f32                   -- VMEM-resident
    w2_ref: (1, H)     f32                   -- VMEM-resident (row layout of lin2 weight)
    b2_ref: (1, 1)     f32 in SMEM           -- scalar
    o_ref : (1, TB)    f32                   -- lane-dense output row
    """
    # First layer on the MXU, f32 accumulation.
    h = jnp.dot(x_ref[...], w1_ref[...],
                preferred_element_type=jnp.float32)          # (TB, H)
    h = jnp.maximum(h + b1_ref[...], 0.0)                    # bias + ReLU (VPU, f32)

    # Second layer as (1, H) · (TB, H)^T -> (1, TB): per-row results land along
    # lanes, so the store below is an unmasked, lane-dense vector store.
    o = jax.lax.dot_general(
        w2_ref[...], h,
        dimension_numbers=(((1,), (1,)), ((), ())),
        preferred_element_type=jnp.float32,
    )                                                        # (1, TB)
    o_ref[...] = (o + b2_ref[0, 0]).astype(o_ref.dtype)


def linear_lag_decoder(x, w1, b1, w2, b2, *, block_b=128,
                       compute_dtype=jnp.bfloat16):
    """Fused forward pass of LinearLagDecoder.

    x : (B, D_in) f32
    w1: (D_in, H) f32 (transpose of PyTorch lin1.weight), b1: (1, H) f32
    w2: (H, 1)    f32 (transpose of PyTorch lin2.weight), b2: (1, 1) f32
    returns (B, 1) f32
    """
    B, D_in = x.shape
    H = w1.shape[1]

    # Batch tile: multiple of 128 so the bf16 x-tile sublanes and the lane-dense
    # output row are aligned.  Double-buffered x tiles stay far below the scoped
    # VMEM default even on v7x (64 MiB physical VMEM).
    tb = min(_round_up(block_b, 128), _round_up(B, 128))
    num_tiles = pl.cdiv(B, tb)
    b_pad = num_tiles * tb
    if b_pad != B:
        x = jnp.pad(x, ((0, b_pad - B), (0, 0)))

    # bf16 MXU operands (halves HBM bytes of the x stream); everything
    # elementwise and the final projection stay f32.
    x_c = x.astype(compute_dtype)
    w1_c = w1.astype(compute_dtype)
    w2_row = w2.reshape(1, H).astype(jnp.float32)
    b1_row = b1.reshape(1, H).astype(jnp.float32)
    b2_s = b2.reshape(1, 1).astype(jnp.float32)

    out_row = pl.pallas_call(
        _decoder_kernel,
        out_shape=jax.ShapeDtypeStruct((1, b_pad), jnp.float32),
        grid=(num_tiles,),
        in_specs=[
            pl.BlockSpec((tb, D_in), lambda i: (i, 0)),          # x: streamed
            pl.BlockSpec((D_in, H), lambda i: (0, 0)),           # w1: resident
            pl.BlockSpec((1, H), lambda i: (0, 0)),              # b1: resident
            pl.BlockSpec((1, H), lambda i: (0, 0)),              # w2 row: resident
            pl.BlockSpec(memory_space=pltpu.MemorySpace.SMEM),   # b2: SMEM scalar
        ],
        out_specs=pl.BlockSpec((1, tb), lambda i: (0, i)),       # lane-dense row
        compiler_params=pltpu.CompilerParams(
            dimension_semantics=("parallel",),
        ),
    )(x_c, w1_c, b1_row, w2_row, b2_s)

    return out_row.reshape(-1)[:B].reshape(B, 1)


def init_params(key, input_dim, hidden_dim):
    """Deterministic init mimicking nn.Linear default U(-1/sqrt(fan_in), 1/sqrt(fan_in))."""
    k1, k2, k3, k4 = jax.random.split(key, 4)
    bound1 = 1.0 / jnp.sqrt(input_dim)
    bound2 = 1.0 / jnp.sqrt(hidden_dim)
    w1 = jax.random.uniform(k1, (input_dim, hidden_dim), jnp.float32, -bound1, bound1)
    b1 = jax.random.uniform(k2, (1, hidden_dim), jnp.float32, -bound1, bound1)
    w2 = jax.random.uniform(k3, (hidden_dim, 1), jnp.float32, -bound2, bound2)
    b2 = jax.random.uniform(k4, (1, 1), jnp.float32, -bound2, bound2)
    return w1, b1, w2, b2


if __name__ == "__main__":
    # Lane-aligned small sizes (multiples of 128) so the grid actually has
    # several steps to pipeline; toy 8x16x32 shapes would be pure overhead.
    batch, input_dim, hidden_dim = 512, 128, 128

    key = jax.random.PRNGKey(0)
    kx, kp = jax.random.split(key)
    x = jax.random.normal(kx, (batch, input_dim), jnp.float32)
    w1, b1, w2, b2 = init_params(kp, input_dim, hidden_dim)

    out = linear_lag_decoder(x, w1, b1, w2, b2, block_b=128)
    out = jax.block_until_ready(out)

    # Pure-JAX reference using the same bf16 rounding of the MXU operands.
    xr = x.astype(jnp.bfloat16).astype(jnp.float32)
    w1r = w1.astype(jnp.bfloat16).astype(jnp.float32)
    h_ref = jnp.maximum(
        jnp.dot(xr, w1r, precision=jax.lax.Precision.HIGHEST) + b1, 0.0)
    ref = jnp.dot(h_ref, w2, precision=jax.lax.Precision.HIGHEST) + b2

    assert out.shape == (batch, 1)
    assert jnp.allclose(out, ref, atol=1e-2, rtol=1e-2), \
        float(jnp.max(jnp.abs(out - ref)))

    print("KERNEL_OK")
</pallas_src>

<mosaic_0001>
module attributes {stable_mosaic.version = 11 : i64} {
  func.func @_decoder_kernel(%arg0: i32, %arg1: memref<128x128xbf16, #tpu.memory_space<vmem>>, %arg2: memref<128x128xbf16, #tpu.memory_space<vmem>>, %arg3: memref<1x128xf32, #tpu.memory_space<vmem>>, %arg4: memref<1x128xf32, #tpu.memory_space<vmem>>, %arg5: memref<1x1xf32, #tpu.memory_space<smem>>, %arg6: memref<1x128xf32, #tpu.memory_space<vmem>>) attributes {dimension_semantics = [#tpu.dimension_semantics<parallel>], iteration_bounds = array<i64: 4>, scalar_prefetch = 0 : i64, scratch_operands = 0 : i64, tpu.core_type = #tpu.core_type<tc>, window_params = [{transform_indices = @transform_0, window_bounds = array<i64: 128, 128>}, {pipeline_mode = #tpu.pipeline_mode<synchronous>, transform_indices = @transform_1, window_bounds = array<i64: 128, 128>}, {pipeline_mode = #tpu.pipeline_mode<synchronous>, transform_indices = @transform_2, window_bounds = array<i64: 1, 128>}, {pipeline_mode = #tpu.pipeline_mode<synchronous>, transform_indices = @transform_3, window_bounds = array<i64: 1, 128>}, {transform_indices = @transform_4, window_bounds = array<i64: 1, 1>}, {transform_indices = @transform_5, window_bounds = array<i64: 1, 128>}]} {
    %c0 = arith.constant 0 : index
    %c0_0 = arith.constant 0 : index
    %0 = vector.load %arg1[%c0, %c0_0] : memref<128x128xbf16, #tpu.memory_space<vmem>>, vector<128x128xbf16>
    %c0_1 = arith.constant 0 : index
    %c0_2 = arith.constant 0 : index
    %1 = vector.load %arg2[%c0_1, %c0_2] : memref<128x128xbf16, #tpu.memory_space<vmem>>, vector<128x128xbf16>
    %cst = arith.constant dense<0.000000e+00> : vector<128x128xf32>
    %2 = tpu.matmul %0, %1, %cst {dimension_numbers = #tpu.dot_dimension_numbers<[1], [0], [0], [1], [0, 0, 1, 1], [], []>} : vector<128x128xbf16>, vector<128x128xbf16>, vector<128x128xf32> -> vector<128x128xf32>
    %c0_3 = arith.constant 0 : index
    %c0_4 = arith.constant 0 : index
    %3 = vector.load %arg3[%c0_3, %c0_4] : memref<1x128xf32, #tpu.memory_space<vmem>>, vector<1x128xf32>
    %4 = vector.broadcast %3 : vector<1x128xf32> to vector<128x128xf32>
    %5 = arith.addf %2, %4 : vector<128x128xf32>
    %cst_5 = arith.constant 0.000000e+00 : f32
    %6 = vector.broadcast %cst_5 : f32 to vector<128x128xf32>
    %7 = arith.maximumf %5, %6 : vector<128x128xf32>
    %c0_6 = arith.constant 0 : index
    %c0_7 = arith.constant 0 : index
    %8 = vector.load %arg4[%c0_6, %c0_7] : memref<1x128xf32, #tpu.memory_space<vmem>>, vector<1x128xf32>
    %cst_8 = arith.constant dense<0.000000e+00> : vector<1x128xf32>
    %9 = tpu.matmul %8, %7, %cst_8 {dimension_numbers = #tpu.dot_dimension_numbers<[1], [1], [0], [0], [0, 0, 1, 0], [], []>} : vector<1x128xf32>, vector<128x128xf32>, vector<1x128xf32> -> vector<1x128xf32>
    %c0_9 = arith.constant 0 : index
    %c0_10 = arith.constant 0 : index
    %10 = memref.load %arg5[%c0_9, %c0_10] : memref<1x1xf32, #tpu.memory_space<smem>>
    %11 = vector.broadcast %10 : f32 to vector<1x128xf32>
    %12 = arith.addf %9, %11 : vector<1x128xf32>
    %c0_11 = arith.constant 0 : index
    %c0_12 = arith.constant 0 : index
    %13 = vector.load %arg6[%c0_11, %c0_12] : memref<1x128xf32, #tpu.memory_space<vmem>>, vector<1x128xf32>
    tpu.vector_store %arg6[%c0_11, %c0_12], %12 {strides = array<i32>} : memref<1x128xf32, #tpu.memory_space<vmem>>, vector<1x128xf32>,
    return
  }
  func.func @transform_0(%arg0: i32) -> (i32, i32) {
    %c0_i32 = arith.constant 0 : i32
    %c0_i32_0 = arith.constant 0 : i32
    return %arg0, %c0_i32 : i32, i32
  }
  func.func @transform_1(%arg0: i32) -> (i32, i32) {
    %c0_i32 = arith.constant 0 : i32
    %c0_i32_0 = arith.constant 0 : i32
    %c0_i32_1 = arith.constant 0 : i32
    return %c0_i32, %c0_i32_0 : i32, i32
  }
  func.func @transform_2(%arg0: i32) -> (i32, i32) {
    %c0_i32 = arith.constant 0 : i32
    %c0_i32_0 = arith.constant 0 : i32
    %c0_i32_1 = arith.constant 0 : i32
    return %c0_i32, %c0_i32_0 : i32, i32
  }
  func.func @transform_3(%arg0: i32) -> (i32, i32) {
    %c0_i32 = arith.constant 0 : i32
    %c0_i32_0 = arith.constant 0 : i32
    %c0_i32_1 = arith.constant 0 : i32
    return %c0_i32, %c0_i32_0 : i32, i32
  }
  func.func @transform_4(%arg0: i32) -> (i32, i32) {
    %c0_i32 = arith.constant 0 : i32
    %c0_i32_0 = arith.constant 0 : i32
    %c0_i32_1 = arith.constant 0 : i32
    return %c0_i32, %c0_i32_0 : i32, i32
  }
  func.func @transform_5(%arg0: i32) -> (i32, i32) {
    %c0_i32 = arith.constant 0 : i32
    %c0_i32_0 = arith.constant 0 : i32
    return %c0_i32, %arg0 : i32, i32
  }
}

</mosaic_0001>

<bundles_post_ra>
// kernel: tpu_custom_call.1
= control target key start
LH: loop header
LB: loop body
LE: loop exit
PB: predicated region body
PF: predicated region fallthrough
CT: control target
= control target key end

     0   :  { %s1069_s0 = inlined_call_operand.hbm [shape: bf16[512,128], index: 0, kind: input, shape index: {}]   ;;  %s1070_s1 = inlined_call_operand.hbm [shape: bf16[128,128], index: 1, kind: input, shape index: {}]   ;;  %s1071_s2 = inlined_call_operand.vmem [shape: f32[1,128], index: 2, kind: input, shape index: {}]   ;;  %s1072_s3 = inlined_call_operand.vmem [shape: f32[1,128], index: 3, kind: input, shape index: {}]   ;;  %s1073_s4 = inlined_call_operand.<no memory space> [shape: f32[1,1], index: 4, kind: input, shape index: {}]   ;;  %s1074_s5 = inlined_call_operand.hbm [shape: f32[1,512], index: 5, kind: output, shape index: {}]  }
   0x1   :  { %10 = sst [smem:[#allocation2]] %s1073_s4 }
   0x2   :  { %11 = vsyncpa [#allocation4], 0 }
   0x3   :  { %13 = vsyncpa [#allocation4 + $0x1], 0 }
   0x4   :  { %14 = vsyncpa [#allocation7], 0 }
   0x5   :  { %15 = vsyncpa [#allocation5], 0 }
   0x6   :  { %17 = vsyncpa [#allocation5 + $0x1], 0  ;;  %s910_s20 = smov 0   ;;  %s912_s21 = smov 0  }
   0x7   :  { %s914_s22 = smov 0   ;;  %s916_s23 = smov 0  }
   0x8 LB: > { %s931_s4 = sadd.s32 4294967295, %s872_s23   ;;  %s573_s24 = sadd.s32 4294967294, %s872_s23   ;;  %s872_s23 = sphi %s916_s23, %s1083_s23   ;;  %s868_s22 = sphi %s914_s22, %s1082_s22   ;;  %s864_s21 = sphi %s912_s21, %s1081_s21   ;;  %s860_s20 = sphi %s910_s20, %s1080_s20  }
   0x9   : > { %p43_p0 = scmp.ne.s32.totalorder %s864_s21, %s860_s20  ;;  %p44_p1 = scmp.eq.s32.totalorder %s931_s4, 0 }
   0xa   : > { %p151_p2 = scmp.eq.s32.totalorder %s931_s4, 3  ;;  %p157_p3 = scmp.eq.s32.totalorder %s573_s24, 3 }
   0xb   : > { %p940_p4 = por %p44_p1, %p43_p0  ;;  %p574_p5 = scmp.ge.s32.totalorder %s872_s23, 1 }
   0xc   : > { %p945_p6 = por %p157_p3, %p43_p0  ;;  %p164_p7 = scmp.lt.s32.totalorder %s872_s23, 5 }
   0xd   : > { %s175_s29 = sshll.u32 %s1070_s1, 4  ;;  %s874_s6 = smov [#allocation6]   ;;  %s176_s29 = int_to_ptr.hbm [resolvable:$true] %s175_s29 }
   0xe   : > { %p953_p8 = pnand %p574_p5, %p164_p7  ;;  %s177_s7 = sshll.u32 %s874_s6, 4  ;;  %s178_s7 = int_to_ptr.vmem [resolvable:$true] %s177_s7 }
   0xf   : > { %s962_s8 = sadd.s32 1, %s872_s23   ;;  %s875_s9 = smov 64  }
  0x10   : > { %p690_p9 = pneg %p953_p8  ;;  %s876_s10 = smov 4  }
  0x11   : > { %s27_s11 = ssub.s32 %s872_s23, %s962_s8  ;;  %s30_s12 = sadd.s32 1, %s868_s22 }
  0x12   : > { %p691_p10 = pnand %p690_p9, %p44_p1  ;;  %p28_p11 = scmp.eq.s32.totalorder %s27_s11, 0 }
  0x13   : > { %p37_p12 = scmp.ne.s32.totalorder %s868_s22, %s864_s21  ;;  %p38_p13 = scmp.eq.s32.totalorder %s872_s23, 0 }
  0x14   : > { %693 = dma.hbm_to_vmem [thread:$0]  (!%p691_p10), %s176_s29, 1024, %s178_s7, [#allocation7], %s875_s9, %s875_s9, %s876_s10  }
  0x15   : > { %s974_s13 = scalar_select %p28_p11, %s868_s22, %s30_s12  }
  0x16   : > { %p978_p0 = por %p151_p2, %p37_p12  ;;  %p703_p3 = scmp.lt.s32.totalorder %s872_s23, 4 }
  0x17   : > { %s200_s15 = sand.u32 1, %s868_s22   ;;  %s649_s16 = sshll.u32 %s872_s23, 6 }
  0x18   : > { %p39_p5 = por %p38_p13, %p37_p12  ;;  %s577_s17 = sshll.u32 %s200_s15, 6 }
  0x19   : > { %s209_s24 = scalar_lea.hbm %s1069_s0, %s649_s16  ;;  %s204_s28 = scalar_lea.vmem [#allocation3], %s577_s17 }
  0x1a   : > { %s210_s27 = sshll.u32 %s209_s24, 4  ;;  %s212_s29 = sshll.u32 %s204_s28, 4  ;;  %s211_s27 = int_to_ptr.hbm [resolvable:$true] %s210_s27  ;;  %s213_s29 = int_to_ptr.vmem [resolvable:$true] %s212_s29 }
  0x1b   : > { %p988_p7 = pnand %p703_p3, %p39_p5  ;;  %s201_s7 = scalar_lea.sflag [#allocation4], %s200_s15 }
  0x1c   : > { %s772_s11 = sshra.s32 %s211_s27, 4  ;;  %s779_s17 = scalar_lea.hbm %s1069_s0, 256  ;;  %s773_s11 = int_to_ptr.hbm [resolvable:$true] %s772_s11 }
  0x1d   : > { %s774_s12 = scalar_lea.hbm %s773_s11, 64  ;;  %p776_p9 = pneg %p988_p7 }
  0x1e   : > { %p775_p2 = scmp.ne.s32.totalorder %s773_s11, %s774_s12  ;;  %p780_p12 = scmp.lt.s32.totalorder %s773_s11, %s1069_s0 }
  0x1f   : > { %p781_p13 = scmp.lt.s32.totalorder %s779_s17, %s774_s12 }
  0x20   : > { %p777_p10 = pnand %p776_p9, %p775_p2 }
  0x21   : > { %p782_p3 = por %p781_p13, %p780_p12 }
  0x22   : > { %p778_p11 = pneg %p777_p10 }
  0x24   : > { %p783_p5 = pnand %p782_p3, %p778_p11 }
  0x26   : > { %786 = shalt.err (!%p783_p5)
}
  0x27   : > { %697 = dma.hbm_to_vmem [thread:$0]  (!%p988_p7), %s211_s27, 1024, %s213_s29, %s201_s7, %s875_s9, %s875_s9, %s876_s10  }
  0x28   : > { %224 = sbr.rel (%p953_p8) target bundleno = 434 (0x1b2), region = 40  ;;  %s1008_s15 = sand.u32 (!%p953_p8), 1, %s864_s21  }
  0x29   : > { %s581_s28 = sshll.u32 (!%p953_p8), %s1008_s15, 6  ;;  %s227_s11 = scalar_lea.sflag (!%p953_p8), [#allocation4], %s1008_s15 }
  0x2a   : > { %s1012_s12 = scalar_lea.vmem (!%p953_p8), [#allocation3], %s581_s28 }
  0x2d   : > { %847 = dma.done.wait (%p940_p4), %s227_s11, 1024  }
  0x2e   : > { %849 = vsyncadd (%p940_p4), %s227_s11, 4294966272 }
  0x2f   : > { %851 = dma.done.wait (%p44_p1), [#allocation7], 1024  }
  0x30   : > { %853 = vsyncadd (%p44_p1), [#allocation7], 4294966272  ;;  %v665_v0 = vld [vmem:[#allocation6 + $0x38] sm:$0xff]  ;;  %v664_v1 = vld [vmem:[#allocation6 + $0x30] sm:$0xff]  ;;  %s461_s27 = sld [smem:[#allocation2]]  ;;  %s493_s7 = scalar_lea.hbm %s1074_s5, %s931_s4 }
  0x31   : > { %666 = vmatpush.bf16.msra.mxu2 %v665_v0  ;;  %667 = vmatpush.bf16.msra.mxu3 %v665_v0  ;;  %v663_v2 = vld [vmem:[#allocation6 + $0x28] sm:$0xff]  ;;  %v662_v3 = vld [vmem:[#allocation6 + $0x20] sm:$0xff]  ;;  %v661_v4 = vld [vmem:[#allocation6 + $0x18] sm:$0xff]  ;;  %s261_s16 = scalar_lea.vmem [#allocation8], %s1008_s15  ;;  %s497_s17 = sshll.u32 %s493_s7, 4  ;;  %s498_s17 = int_to_ptr.hbm [resolvable:$true] %s497_s17 }
  0x32   : > { %395 = vmatpush.bf16.msra.mxu0 %v665_v0  ;;  %v660_v5 = vld [vmem:[#allocation6 + $0x10] sm:$0xff]  ;;  %v659_v6 = vld [vmem:[#allocation6 + $0x8] sm:$0xff]  ;;  %v658_v7 = vld [vmem:[#allocation6] sm:$0xff]  ;;  %s495_s18 = sshll.u32 %s261_s16, 4  ;;  %s485_s19 = scalar_lea.sflag [#allocation5], %s1008_s15  ;;  %s496_s18 = int_to_ptr.vmem [resolvable:$true] %s495_s18 }
  0x33   : > { %v653_v8 = vld [vmem:[%s1012_s12 + $0x18] sm:$0xff]  ;;  %v656_v9 = vld [vmem:[%s1012_s12 + $0x30] sm:$0xff]  ;;  %v650_v10 = vld [vmem:[%s1012_s12] sm:$0xff]  ;;  %s816_s24 = sshra.s32 %s498_s17, 4  ;;  %s822_s4 = scalar_lea.hbm %s1074_s5, 4  ;;  %s817_s24 = int_to_ptr.hbm [resolvable:$true] %s816_s24 }
  0x34   : > { %v654_v11 = vld [vmem:[%s1012_s12 + $0x20] sm:$0xff]  ;;  %v657_v12 = vld [vmem:[%s1012_s12 + $0x38] sm:$0xff]  ;;  %v651_v13 = vld [vmem:[%s1012_s12 + $0x8] sm:$0xff]  ;;  %s818_s28 = scalar_lea.hbm %s817_s24, 1  ;;  %p823_p7 = scmp.lt.s32.totalorder %s817_s24, %s1074_s5 }
  0x35   : > { %668 = vmatpush.bf16.msra.mxu2 %v664_v1  ;;  %669 = vmatpush.bf16.msra.mxu3 %v664_v1  ;;  %v655_v14 = vld [vmem:[%s1012_s12 + $0x28] sm:$0xff]  ;;  %v652_v15 = vld [vmem:[%s1012_s12 + $0x10] sm:$0xff]  ;;  %v741_v24 = vld [vmem:[%s1071_s2] ss:$0 sm:$0xff]  ;;  %p819_p1 = scmp.ne.s32.totalorder %s817_s24, %s818_s28  ;;  %p824_p2 = scmp.lt.s32.totalorder %s822_s4, %s818_s28 }
  0x36   : > { %396 = vmatpush.bf16.msra.mxu0 %v664_v1  ;;  %v460_v1 = vld [vmem:[%s1072_s3] sm:$0x1] }
  0x37   : > { %p820_p4 = pnand %p819_p1, %p978_p0  ;;  %p825_p9 = por %p824_p2, %p823_p7 }
  0x39   : > { %670 = vmatpush.bf16.msra.mxu2 %v663_v2  ;;  %671 = vmatpush.bf16.msra.mxu3 %v663_v2  ;;  %p821_p8 = pneg %p820_p4 }
  0x3a   : > { %397 = vmatpush.bf16.msra.mxu0 %v663_v2  ;;  %v462_v2 = vstv %s461_s27 }
  0x3b   : > { %p826_p10 = pnand %p825_p9, %p821_p8 }
  0x3d   : > { %672 = vmatpush.bf16.msra.mxu2 %v662_v3  ;;  %673 = vmatpush.bf16.msra.mxu3 %v662_v3 }
  0x3e   : > { %398 = vmatpush.bf16.msra.mxu0 %v662_v3 }
  0x41   : > { %674 = vmatpush.bf16.msra.mxu2 %v661_v4  ;;  %675 = vmatpush.bf16.msra.mxu3 %v661_v4 }
  0x42   : > { %399 = vmatpush.bf16.msra.mxu0 %v661_v4 }
  0x45   : > { %676 = vmatpush.bf16.msra.mxu2 %v660_v5  ;;  %677 = vmatpush.bf16.msra.mxu3 %v660_v5 }
  0x46   : > { %400 = vmatpush.bf16.msra.mxu0 %v660_v5 }
  0x49   : > { %678 = vmatpush.bf16.msra.mxu2 %v659_v6  ;;  %679 = vmatpush.bf16.msra.mxu3 %v659_v6 }
  0x4a   : > { %401 = vmatpush.bf16.msra.mxu0 %v659_v6 }
  0x4d   : > { %680 = vmatpush.bf16.msra.mxu2 %v658_v7  ;;  %681 = vmatpush.bf16.msra.mxu3 %v658_v7 }
  0x4e   : > { %402 = vmatpush.bf16.msra.mxu0 %v658_v7 }
  0x50   : > { %418 = vmatmul.bf16.vlgmr.msra.gmra.mxu2 %v653_v8  ;;  %433 = vmatmul.bf16.vlgmr.msra.gmra.mxu3 %v656_v9 }
  0x51   : > { %403 = vmatmul.bf16.vlgmr.msra.gmra.mxu0 %v650_v10 }
  0x60   : > { %423 = vmatmul.bf16.gmra.mxu2 %v654_v11  ;;  %438 = vmatmul.bf16.gmra.mxu3 %v657_v12 }
  0x61   : > { %408 = vmatmul.bf16.gmra.mxu0 %v651_v13 }
  0x70   : > { %428 = vmatmul.bf16.gmra.mxu2 %v655_v14 }
  0x71   : > { %413 = vmatmul.bf16.gmra.mxu0 %v652_v15 }
  0xce   : > { %v404_v20 = vpop.f32.mrf.mxu0 }
  0xcf   : > { %v405_v62 = vadd.f32 %v741_v24, %v404_v20 }
  0xd1   : > { %v444_v0 = vmax.f32 %v405_v62, 0.0 }
  0xd3   : > { %v419_v16 = vpop.f32.mrf.mxu2  ;;  %v434_v17 = vpop.f32.mrf.mxu3 }
  0xd4   : > { %v435_v34 = vadd.f32 %v741_v24, %v434_v17  ;;  %v420_v49 = vadd.f32 %v741_v24, %v419_v16 }
  0xd6   : > { %v406_v23 = vpop.f32.mrf.mxu0  ;;  %v456_v36 = vmax.f32 %v435_v34, 0.0  ;;  %v450_v52 = vmax.f32 %v420_v49, 0.0 }
  0xd7   : > { %v407_v60 = vadd.f32 %v741_v24, %v406_v23 }
  0xd9   : > { %v445_v63 = vmax.f32 %v407_v60, 0.0 }
  0xdb   : > { %v421_v18 = vpop.f32.mrf.mxu2  ;;  %v436_v19 = vpop.f32.mrf.mxu3 }
  0xdc   : > { %v437_v31 = vadd.f32 %v741_v24, %v436_v19  ;;  %v422_v47 = vadd.f32 %v741_v24, %v421_v18 }
  0xde   : > { %v409_v30 = vpop.f32.mrf.mxu0  ;;  %v457_v35 = vmax.f32 %v437_v31, 0.0  ;;  %v451_v50 = vmax.f32 %v422_v47, 0.0 }
  0xdf   : > { %v410_v58 = vadd.f32 %v741_v24, %v409_v30 }
  0xe1   : > { %v446_v61 = vmax.f32 %v410_v58, 0.0 }
  0xe3   : > { %v424_v21 = vpop.f32.mrf.mxu2  ;;  %v439_v22 = vpop.f32.mrf.mxu3 }
  0xe4   : > { %v440_v28 = vadd.f32 %v741_v24, %v439_v22  ;;  %v425_v45 = vadd.f32 %v741_v24, %v424_v21 }
  0xe6   : > { %v458_v32 = vmax.f32 %v440_v28, 0.0  ;;  %v411_v37 = vpop.f32.mrf.mxu0  ;;  %v452_v48 = vmax.f32 %v425_v45, 0.0 }
  0xe7   : > { %v412_v56 = vadd.f32 %v741_v24, %v411_v37 }
  0xe9   : > { %v447_v59 = vmax.f32 %v412_v56, 0.0 }
  0xeb   : > { %v426_v25 = vpop.f32.mrf.mxu2  ;;  %v441_v26 = vpop.f32.mrf.mxu3 }
  0xec   : > { %v442_v27 = vadd.f32 %v741_v24, %v441_v26  ;;  %v427_v42 = vadd.f32 %v741_v24, %v426_v25 }
  0xee   : > { %v459_v29 = vmax.f32 %v442_v27, 0.0  ;;  %v414_v44 = vpop.f32.mrf.mxu0  ;;  %v453_v46 = vmax.f32 %v427_v42, 0.0 }
  0xef   : > { %v415_v54 = vadd.f32 %v741_v24, %v414_v44 }
  0xf0   : > { %463 = vmatpush.xpose.msra.mxu1 %v459_v29 }
  0xf1   : > { %v448_v57 = vmax.f32 %v415_v54, 0.0 }
  0xf3   : > { %v429_v33 = vpop.f32.mrf.mxu2 }
  0xf4   : > { %464 = vmatpush.xpose.msra.mxu1 %v458_v32  ;;  %v430_v40 = vadd.f32 %v741_v24, %v429_v33 }
  0xf6   : > { %v454_v43 = vmax.f32 %v430_v40, 0.0  ;;  %v416_v51 = vpop.f32.mrf.mxu0 }
  0xf7   : > { %v417_v53 = vadd.f32 %v741_v24, %v416_v51 }
  0xf8   : > { %465 = vmatpush.xpose.msra.mxu1 %v457_v35 }
  0xf9   : > { %v449_v55 = vmax.f32 %v417_v53, 0.0 }
  0xfb   : > { %v431_v38 = vpop.f32.mrf.mxu2 }
  0xfc   : > { %v432_v39 = vadd.f32 %v741_v24, %v431_v38  ;;  %466 = vmatpush.xpose.msra.mxu1 %v456_v36 }
  0xfe   : > { %v455_v41 = vmax.f32 %v432_v39, 0.0 }
 0x100   : > { %467 = vmatpush.xpose.msra.mxu1 %v455_v41 }
 0x104   : > { %468 = vmatpush.xpose.msra.mxu1 %v454_v43 }
 0x108   : > { %469 = vmatpush.xpose.msra.mxu1 %v453_v46 }
 0x10c   : > { %470 = vmatpush.xpose.msra.mxu1 %v452_v48 }
 0x110   : > { %471 = vmatpush.xpose.msra.mxu1 %v451_v50 }
 0x114   : > { %472 = vmatpush.xpose.msra.mxu1 %v450_v52 }
 0x118   : > { %473 = vmatpush.xpose.msra.mxu1 %v449_v55 }
 0x11c   : > { %474 = vmatpush.xpose.msra.mxu1 %v448_v57 }
 0x120   : > { %475 = vmatpush.xpose.msra.mxu1 %v447_v59 }
 0x124   : > { %476 = vmatpush.xpose.msra.mxu1 %v446_v61 }
 0x128   : > { %477 = vmatpush.xpose.msra.mxu1 %v445_v63 }
 0x12c   : > { %478 = vmatpush.xpose.msra.mxu1 %v444_v0 }
 0x12f   : > { %479 = vmatmul.f32.vlgmr.msra.gmra.mxu1 %v460_v1 }
 0x1ac   : > { %v480_v3 = vpop.f32.mrf.mxu1 }
 0x1ad   : > { %v481_v4 = vadd.f32 %v480_v3, %v462_v2 }
 0x1af   : > { %483 = vst [vmem:[%s261_s16] sm:$0x1] %v481_v4 }
 0x1b0   : > { %829 = shalt.err (!%p826_p10)
}
 0x1b1   : > { %688 = dma.vmem_to_hbm [thread:$0]  (%p978_p0), %s496_s18, 16, %s498_s17, %s485_s19  }
 0x1b2 PF: > { %p705_p11 = scmp.ge.s32.totalorder %s872_s23, 2  ;;  %s509_s15 = sand.u32 1, %s860_s20  }
 0x1b3   : > { %s510_s9 = scalar_lea.sflag [#allocation5], %s509_s15 }
 0x1b4   : > { %p699_p12 = pnand %p705_p11, %p945_p6 }
 0x1b6   : > { %p700_p13 = pneg %p699_p12 }
 0x1b8   : > { %855 = dma.done.wait (%p700_p13), %s510_s9, 16  }
 0x1b9   : > { %857 = vsyncadd (%p700_p13), %s510_s9, 4294967280  ;;  %p20_p3 = scmp.ge.s32.totalorder %s962_s8, 6   ;;  %s1080_s20 = smov %s864_s21 }
 0x1ba   : > { %s1081_s21 = smov %s868_s22  ;;  %s1082_s22 = smov %s974_s13 }
 0x1bb   : > { %s1083_s23 = smov %s962_s8  ;;  %22 = sbr.rel (!%p20_p3) target bundleno = 8 (0x8), region = 89 }
 0x1c0   :  { %515 = vsyncpa [#allocation4], 1 }
 0x1c1   :  { %517 = vsyncpa [#allocation4 + $0x1], 1 }
 0x1c2   :  { %518 = vsyncpa [#allocation7], 1 }
 0x1c3   :  { %519 = vsyncpa [#allocation5], 1 }
 0x1c4   :  { %521 = vsyncpa [#allocation5 + $0x1], 1 }

</bundles_post_ra>
